<compile_context>
chip_gen: v7x
topology: tpu7x:2x2x1
jax: 0.10.0
libtpu: 0.0.40
codegen_flags: <defaults>
</compile_context>

<pallas_src>
import functools

import jax
import jax.numpy as jnp
from jax.experimental import pallas as pl
from jax.experimental.pallas import tpu as pltpu


def _round_up(x, m):
    return (x + m - 1) // m * m


def _router_kernel(x_ref, w_ref, b_ref, g_ref,
                   probs_ref, idx_ref, part_ref,
                   *, top_k, num_experts, n_tokens, mxu_dtype):
    i = pl.program_id(0)
    E = num_experts
    tm = probs_ref.shape[1]

    # Cast activations to the MXU dtype in VMEM (x streams from HBM natively;
    # no separate wrapper-side cast/pad pass over HBM).
    x = x_ref[...].astype(mxu_dtype)                       # (TM, D)

    # (2E, TM) = W_fused @ x^T : contraction over the minor dims of both
    # operands (the q.k^T pattern) -> the MXU result pops out already in the
    # lane-dense transposed layout, no in-kernel transpose required.
    both = jax.lax.dot_general(
        w_ref[...], x, (((1,), (1,)), ((), ())),
        preferred_element_type=jnp.float32) + b_ref[...]   # (2E, TM) f32

    logits = both[:E, :]                                   # (E, TM) sublane slice
    noise_logits = both[E:, :]                              # (E, TM)
    noisy = logits + g_ref[...] * jax.nn.softplus(noise_logits)

    # Static-unrolled top-k over the expert (sublane) axis with lowest-index
    # tie-break (matches lax.top_k / torch.topk).
    rowi = jax.lax.broadcasted_iota(jnp.int32, noisy.shape, 0)
    work = noisy
    keep = jnp.zeros(noisy.shape, dtype=jnp.bool_)
    idx_rows = []
    for _ in range(top_k):
        m = jnp.max(work, axis=0, keepdims=True)            # (1, TM)
        is_max = work == m
        sel_idx = jnp.min(jnp.where(is_max, rowi, E), axis=0, keepdims=True)
        sel = rowi == sel_idx
        keep = jnp.logical_or(keep, sel)
        work = jnp.where(sel, -jnp.inf, work)
        idx_rows.append(sel_idx)
    idx_ref[...] = jnp.concatenate(idx_rows, axis=0)        # (top_k, TM) int32

    # Sparse softmax over the kept experts (exp(-inf) == 0 exactly).
    sparse = jnp.where(keep, noisy, -jnp.inf)
    smax = jnp.max(sparse, axis=0, keepdims=True)
    e = jnp.exp(sparse - smax)
    # pl.reciprocal(approx=True) would move the divide to the EUP, but its error
    # budget breaks the tight sum-to-one / reference tolerances; keep exact.
    probs = e * pl.reciprocal(jnp.sum(e, axis=0, keepdims=True), approx=False)
    probs_ref[...] = probs                                  # lane-dense store

    # Per-block load-balance partial sums; ragged-tail / garbage token lanes are
    # masked via `where` (not multiply) so stale-VMEM NaNs cannot leak in.
    tok = jax.lax.broadcasted_iota(jnp.int32, (1, tm), 1) + i * tm
    valid = tok < n_tokens                                   # (1, TM) bool
    psum = jnp.sum(jnp.where(valid, probs, 0.0), axis=1, keepdims=True)
    msum = jnp.sum(jnp.where(valid, keep.astype(jnp.float32), 0.0),
                   axis=1, keepdims=True)
    part_ref[...] = jnp.concatenate([psum, msum], axis=1)    # single (E, 2) store


def noisy_topk_router(x, w_route, b_route, w_noise, b_noise, gauss, *,
                      top_k, row_tile=1024, mxu_dtype=jnp.bfloat16):
    """x: (B, T, D); w_*: (E, D); b_*: (E,); gauss: (B, T, E) std normals."""
    B, T, D = x.shape
    E = w_route.shape[0]
    N = B * T
    assert 0 < top_k <= E, "top_k must be in (0, num_experts]"

    # Reshape is metadata-only; x keeps its native dtype (no HBM cast pass).
    x2 = x.reshape(N, D)
    # Noise is only E-wide; transpose it once in the wrapper so the kernel's
    # epilogue is fully lane-dense with zero in-kernel transposes.
    gT = jnp.asarray(gauss, jnp.float32).reshape(N, E).T     # (E, N)

    x_bytes = jnp.dtype(x2.dtype).itemsize
    w_bytes = jnp.dtype(mxu_dtype).itemsize

    def tile_bytes(tm):
        x_b = 2 * tm * D * x_bytes                       # double-buffered activations
        g_b = 2 * tm * E * 4                             # double-buffered noise
        w_b = 2 * (2 * E * D * w_bytes + 2 * E * 4)      # fused weights + bias
        o_b = 2 * (tm * E * 4 + tm * top_k * 4 + 2 * E * 4)
        epi = 8 * tm * 2 * E * 4                         # f32 epilogue live values
        return x_b + g_b + w_b + o_b + epi

    # Generation-aware VMEM sizing: leave ~16 MiB of headroom for Mosaic
    # internal scratch and never request the whole device (v7x: 64 MiB phys).
    try:
        phys_vmem = int(pltpu.get_tpu_info().vmem_capacity_bytes)
    except Exception:
        phys_vmem = 64 * 2**20                            # conservative (v7x)
    vmem_cap = max(16 * 2**20, phys_vmem - 16 * 2**20)
    vmem_budget = min(vmem_cap, 96 * 2**20)               # ~48 MiB v7x, 96 MiB v5e/v6e

    if N >= 256:
        # Lane-major outputs: TM must be a multiple of 128.  Grow by doubling up
        # to row_tile (<=1024) while the VMEM budget holds and the grid keeps at
        # least 2 steps (so v7x megacore has work for both TensorCores).
        tm = 128
        tm_max = min(row_tile, 1024)
        while (tm * 2 <= tm_max and tile_bytes(tm * 2) <= vmem_budget
               and pl.cdiv(N, tm * 2) >= 2):
            tm *= 2
        TM = tm
        G = pl.cdiv(N, TM)
        N_out = N            # ragged tail: partial blocks + in-kernel masking
    else:
        # Tiny problem: single block equal to the full (padded-to-8) extent.
        TM = _round_up(N, 8)
        G = 1
        N_out = TM
        if N_out != N:       # negligible pad, only on the E-wide noise array
            gT = jnp.pad(gT, ((0, 0), (0, N_out - N)))

    # Fused projection: rows [0:E] = route head, rows [E:2E] = noise head.
    w_r = jnp.concatenate([jnp.asarray(w_route, jnp.float32),
                           jnp.asarray(w_noise, jnp.float32)],
                          axis=0).astype(mxu_dtype)          # (2E, D)
    b_c = jnp.concatenate([jnp.asarray(b_route, jnp.float32),
                           jnp.asarray(b_noise, jnp.float32)],
                          axis=0).reshape(2 * E, 1)          # (2E, 1) f32

    kernel = functools.partial(_router_kernel, top_k=top_k, num_experts=E,
                               n_tokens=N, mxu_dtype=mxu_dtype)

    vmem_limit = int(min(vmem_cap, max(16 * 2**20, int(1.5 * tile_bytes(TM)))))

    probs_t, idx_t, partial = pl.pallas_call(
        kernel,
        out_shape=(
            jax.ShapeDtypeStruct((E, N_out), jnp.float32),
            jax.ShapeDtypeStruct((top_k, N_out), jnp.int32),
            jax.ShapeDtypeStruct((G, E, 2), jnp.float32),
        ),
        grid_spec=pltpu.PrefetchScalarGridSpec(
            num_scalar_prefetch=0,
            grid=(G,),
            in_specs=[
                pl.BlockSpec((TM, D), lambda i: (i, 0)),        # x rows (native dtype)
                pl.BlockSpec((2 * E, D), lambda i: (0, 0)),     # fused weight (2E, D)
                pl.BlockSpec((2 * E, 1), lambda i: (0, 0)),     # fused bias
                pl.BlockSpec((E, TM), lambda i: (0, i)),        # gaussian noise (E, N)
            ],
            out_specs=[
                pl.BlockSpec((E, TM), lambda i: (0, i)),        # router_probs^T
                pl.BlockSpec((top_k, TM), lambda i: (0, i)),    # indices^T
                pl.BlockSpec((None, E, 2), lambda i: (i, 0, 0)),  # partial sums
            ],
        ),
        compiler_params=pltpu.CompilerParams(
            dimension_semantics=("parallel",),
            vmem_limit_bytes=vmem_limit,
        ),
    )(x2, w_r, b_c, gT)

    probs = probs_t[:, :N].T.reshape(B, T, E)
    idx = idx_t[:, :N].T.reshape(B, T, top_k)

    # Finalize the scalar load-balance loss with a tiny plain-JAX reduction.
    prob_sum = jnp.sum(partial[:, :, 0], axis=0)              # (E,)
    mask_sum = jnp.sum(partial[:, :, 1], axis=0)              # (E,)
    loss = E * jnp.sum((prob_sum / N) * (mask_sum / N))
    return probs, idx, loss


def _reference(x, w_route, b_route, w_noise, b_noise, gauss, top_k, mxu_dtype):
    """Pure-JAX mirror of the PyTorch module; matmul inputs cast like the kernel."""
    E = w_route.shape[0]
    xm = x.astype(mxu_dtype)
    logits = jnp.dot(xm, w_route.astype(mxu_dtype).T,
                     preferred_element_type=jnp.float32) + b_route
    noise_logits = jnp.dot(xm, w_noise.astype(mxu_dtype).T,
                           preferred_element_type=jnp.float32) + b_noise
    noisy = logits + gauss * jax.nn.softplus(noise_logits)
    _, idx = jax.lax.top_k(noisy, top_k)
    keep = jnp.sum(jax.nn.one_hot(idx, E, dtype=jnp.float32), axis=-2) > 0
    sparse = jnp.where(keep, noisy, -jnp.inf)
    probs = jax.nn.softmax(sparse, axis=-1)
    expert_prob = probs.mean(axis=(0, 1))
    expert_count = keep.astype(jnp.float32).mean(axis=(0, 1))
    loss = E * jnp.sum(expert_prob * expert_count)
    return probs, idx, loss


if __name__ == "__main__":
    B, T, D, E, TOP_K = 2, 8, 32, 8, 2

    key = jax.random.PRNGKey(0)
    kx, kg, kw1, kb1, kw2, kb2 = jax.random.split(key, 6)
    x = jax.random.normal(kx, (B, T, D), dtype=jnp.float32)
    # torch.randn_like noise supplied explicitly so the kernel is deterministic
    # and comparable to the reference (pltpu.prng_* could generate it in-kernel).
    gauss = jax.random.normal(kg, (B, T, E), dtype=jnp.float32)
    bound = 1.0 / (D ** 0.5)
    w_route = jax.random.uniform(kw1, (E, D), jnp.float32, -bound, bound)
    b_route = jax.random.uniform(kb1, (E,), jnp.float32, -bound, bound)
    w_noise = jax.random.uniform(kw2, (E, D), jnp.float32, -bound, bound)
    b_noise = jax.random.uniform(kb2, (E,), jnp.float32, -bound, bound)

    # Check both the exact-f32 path and the recommended bf16-MXU path.
    for mxu_dtype, tol in ((jnp.float32, 2e-4), (jnp.bfloat16, 1e-3)):
        probs, idx, loss = noisy_topk_router(
            x, w_route, b_route, w_noise, b_noise, gauss,
            top_k=TOP_K, mxu_dtype=mxu_dtype)
        jax.block_until_ready((probs, idx, loss))

        r_probs, r_idx, r_loss = _reference(
            x, w_route, b_route, w_noise, b_noise, gauss, TOP_K, mxu_dtype)

        assert probs.shape == (B, T, E) and idx.shape == (B, T, TOP_K)
        assert jnp.allclose(probs, r_probs, atol=tol, rtol=tol)
        assert jnp.array_equal(idx, r_idx.astype(jnp.int32))
        assert jnp.allclose(loss, r_loss, atol=tol, rtol=tol)
        assert jnp.allclose(jnp.sum(probs, axis=-1), 1.0, atol=1e-5)

    print("KERNEL_OK")
</pallas_src>

<mosaic_0001>
module attributes {stable_mosaic.version = 11 : i64} {
  func.func @_router_kernel(%arg0: i32, %arg1: memref<16x32xf32, #tpu.memory_space<vmem>>, %arg2: memref<16x32xf32, #tpu.memory_space<vmem>>, %arg3: memref<16x1xf32, #tpu.memory_space<vmem>>, %arg4: memref<8x16xf32, #tpu.memory_space<vmem>>, %arg5: memref<8x16xf32, #tpu.memory_space<vmem>>, %arg6: memref<2x16xi32, #tpu.memory_space<vmem>>, %arg7: memref<1x8x2xf32, #tpu.memory_space<vmem>>) attributes {dimension_semantics = [#tpu.dimension_semantics<parallel>], iteration_bounds = array<i64: 1>, scalar_prefetch = 0 : i64, scratch_operands = 0 : i64, tpu.core_type = #tpu.core_type<tc>, window_params = [{transform_indices = @transform_0, window_bounds = array<i64: 16, 32>}, {pipeline_mode = #tpu.pipeline_mode<synchronous>, transform_indices = @transform_1, window_bounds = array<i64: 16, 32>}, {pipeline_mode = #tpu.pipeline_mode<synchronous>, transform_indices = @transform_2, window_bounds = array<i64: 16, 1>}, {transform_indices = @transform_3, window_bounds = array<i64: 8, 16>}, {transform_indices = @transform_4, window_bounds = array<i64: 8, 16>}, {transform_indices = @transform_5, window_bounds = array<i64: 2, 16>}, {transform_indices = @transform_6, window_bounds = array<i64: 1, 8, 2>}]} {
    %c0 = arith.constant 0 : index
    %c0_0 = arith.constant 0 : index
    %0 = vector.load %arg1[%c0, %c0_0] : memref<16x32xf32, #tpu.memory_space<vmem>>, vector<16x32xf32>
    %c0_1 = arith.constant 0 : index
    %c0_2 = arith.constant 0 : index
    %1 = vector.load %arg2[%c0_1, %c0_2] : memref<16x32xf32, #tpu.memory_space<vmem>>, vector<16x32xf32>
    %cst = arith.constant dense<0.000000e+00> : vector<16x16xf32>
    %2 = tpu.matmul %1, %0, %cst {dimension_numbers = #tpu.dot_dimension_numbers<[1], [1], [0], [0], [0, 0, 1, 0], [], []>} : vector<16x32xf32>, vector<16x32xf32>, vector<16x16xf32> -> vector<16x16xf32>
    %c0_3 = arith.constant 0 : index
    %c0_4 = arith.constant 0 : index
    %3 = vector.load %arg3[%c0_3, %c0_4] : memref<16x1xf32, #tpu.memory_space<vmem>>, vector<16x1xf32>
    %4 = vector.broadcast %3 : vector<16x1xf32> to vector<16x16xf32>
    %5 = arith.addf %2, %4 : vector<16x16xf32>
    %6 = vector.extract_strided_slice %5 {offsets = [0, 0], sizes = [8, 16], strides = [1, 1]} : vector<16x16xf32> to vector<8x16xf32>
    %7 = vector.extract_strided_slice %5 {offsets = [8, 0], sizes = [8, 16], strides = [1, 1]} : vector<16x16xf32> to vector<8x16xf32>
    %c0_5 = arith.constant 0 : index
    %c0_6 = arith.constant 0 : index
    %8 = vector.load %arg4[%c0_5, %c0_6] : memref<8x16xf32, #tpu.memory_space<vmem>>, vector<8x16xf32>
    %cst_7 = arith.constant 0.000000e+00 : f32
    %9 = vector.broadcast %cst_7 : f32 to vector<8x16xf32>
    %10 = arith.maximumf %7, %9 : vector<8x16xf32>
    %11 = vector.broadcast %cst_7 : f32 to vector<8x16xf32>
    %12 = arith.subf %7, %11 : vector<8x16xf32>
    %13 = arith.cmpf one, %12, %12 : vector<8x16xf32>
    %14 = vector.broadcast %cst_7 : f32 to vector<8x16xf32>
    %15 = arith.addf %7, %14 : vector<8x16xf32>
    %16 = math.absf %12 : vector<8x16xf32>
    %cst_8 = arith.constant 0.000000e+00 : f32
    %17 = vector.broadcast %cst_8 : f32 to vector<8x16xf32>
    %18 = arith.subf %17, %16 : vector<8x16xf32>
    %19 = math.exp %18 : vector<8x16xf32>
    %20 = math.log1p %19 : vector<8x16xf32>
    %21 = arith.addf %10, %20 : vector<8x16xf32>
    %22 = arith.select %13, %15, %21 : vector<8x16xi1>, vector<8x16xf32>
    %23 = arith.mulf %8, %22 : vector<8x16xf32>
    %24 = arith.addf %6, %23 : vector<8x16xf32>
    %25 = tpu.iota {dimensions = array<i32: 0>} : vector<8x16xi32>
    %false = arith.constant false
    %26 = vector.broadcast %false : i1 to vector<8x16xi1>
    %cst_9 = arith.constant dense<0xFF800000> : vector<16xf32>
    %27 = vector.multi_reduction <maximumf>, %24, %cst_9 [0] : vector<8x16xf32> to vector<16xf32>
    %28 = vector.shape_cast %27 : vector<16xf32> to vector<1x16xf32>
    %29 = vector.broadcast %28 : vector<1x16xf32> to vector<8x16xf32>
    %30 = arith.cmpf oeq, %24, %29 : vector<8x16xf32>
    %c8_i32 = arith.constant 8 : i32
    %31 = vector.broadcast %c8_i32 : i32 to vector<8x16xi32>
    %32 = arith.select %30, %25, %31 : vector<8x16xi1>, vector<8x16xi32>
    %cst_10 = arith.constant dense<2147483647> : vector<16xi32>
    %33 = vector.multi_reduction <minsi>, %32, %cst_10 [0] : vector<8x16xi32> to vector<16xi32>
    %34 = vector.shape_cast %33 : vector<16xi32> to vector<1x16xi32>
    %35 = vector.broadcast %34 : vector<1x16xi32> to vector<8x16xi32>
    %36 = arith.cmpi eq, %25, %35 : vector<8x16xi32>
    %37 = arith.ori %26, %36 : vector<8x16xi1>
    %cst_11 = arith.constant 0xFF800000 : f32
    %38 = vector.broadcast %cst_11 : f32 to vector<8x16xf32>
    %39 = arith.select %36, %38, %24 : vector<8x16xi1>, vector<8x16xf32>
    %cst_12 = arith.constant dense<0xFF800000> : vector<16xf32>
    %40 = vector.multi_reduction <maximumf>, %39, %cst_12 [0] : vector<8x16xf32> to vector<16xf32>
    %41 = vector.shape_cast %40 : vector<16xf32> to vector<1x16xf32>
    %42 = vector.broadcast %41 : vector<1x16xf32> to vector<8x16xf32>
    %43 = arith.cmpf oeq, %39, %42 : vector<8x16xf32>
    %c8_i32_13 = arith.constant 8 : i32
    %44 = vector.broadcast %c8_i32_13 : i32 to vector<8x16xi32>
    %45 = arith.select %43, %25, %44 : vector<8x16xi1>, vector<8x16xi32>
    %cst_14 = arith.constant dense<2147483647> : vector<16xi32>
    %46 = vector.multi_reduction <minsi>, %45, %cst_14 [0] : vector<8x16xi32> to vector<16xi32>
    %47 = vector.shape_cast %46 : vector<16xi32> to vector<1x16xi32>
    %48 = vector.broadcast %47 : vector<1x16xi32> to vector<8x16xi32>
    %49 = arith.cmpi eq, %25, %48 : vector<8x16xi32>
    %50 = arith.ori %37, %49 : vector<8x16xi1>
    %51 = tpu.concatenate %34, %47 in 0 : vector<1x16xi32>, vector<1x16xi32> -> vector<2x16xi32>
    %c0_15 = arith.constant 0 : index
    %c0_16 = arith.constant 0 : index
    %52 = vector.load %arg6[%c0_15, %c0_16] : memref<2x16xi32, #tpu.memory_space<vmem>>, vector<2x16xi32>
    tpu.vector_store %arg6[%c0_15, %c0_16], %51 {strides = array<i32>} : memref<2x16xi32, #tpu.memory_space<vmem>>, vector<2x16xi32>,
    %cst_17 = arith.constant 0xFF800000 : f32
    %53 = vector.broadcast %cst_17 : f32 to vector<8x16xf32>
    %54 = arith.select %50, %24, %53 : vector<8x16xi1>, vector<8x16xf32>
    %cst_18 = arith.constant dense<0xFF800000> : vector<16xf32>
    %55 = vector.multi_reduction <maximumf>, %54, %cst_18 [0] : vector<8x16xf32> to vector<16xf32>
    %56 = vector.shape_cast %55 : vector<16xf32> to vector<1x16xf32>
    %57 = vector.broadcast %56 : vector<1x16xf32> to vector<8x16xf32>
    %58 = arith.subf %54, %57 : vector<8x16xf32>
    %59 = math.exp %58 : vector<8x16xf32>
    %cst_19 = arith.constant dense<0.000000e+00> : vector<16xf32>
    %60 = vector.multi_reduction <add>, %59, %cst_19 [0] : vector<8x16xf32> to vector<16xf32>
    %61 = vector.shape_cast %60 : vector<16xf32> to vector<1x16xf32>
    %62 = tpu.reciprocal %61 : vector<1x16xf32> -> vector<1x16xf32>
    %63 = vector.broadcast %62 : vector<1x16xf32> to vector<8x16xf32>
    %64 = arith.mulf %59, %63 : vector<8x16xf32>
    %c0_20 = arith.constant 0 : index
    %c0_21 = arith.constant 0 : index
    %65 = vector.load %arg5[%c0_20, %c0_21] : memref<8x16xf32, #tpu.memory_space<vmem>>, vector<8x16xf32>
    tpu.vector_store %arg5[%c0_20, %c0_21], %64 {strides = array<i32>} : memref<8x16xf32, #tpu.memory_space<vmem>>, vector<8x16xf32>,
    %66 = tpu.iota {dimensions = array<i32: 1>} : vector<1x16xi32>
    %c16_i32 = arith.constant 16 : i32
    %67 = arith.muli %arg0, %c16_i32 : i32
    %68 = vector.broadcast %67 : i32 to vector<1x16xi32>
    %69 = arith.addi %66, %68 : vector<1x16xi32>
    %c16_i32_22 = arith.constant 16 : i32
    %70 = vector.broadcast %c16_i32_22 : i32 to vector<1x16xi32>
    %71 = arith.cmpi slt, %69, %70 : vector<1x16xi32>
    %cst_23 = arith.constant 0.000000e+00 : f32
    %72 = vector.shape_cast %71 : vector<1x16xi1> to vector<1x16xi1>
    %73 = vector.broadcast %72 : vector<1x16xi1> to vector<8x16xi1>
    %74 = vector.broadcast %cst_23 : f32 to vector<8x16xf32>
    %75 = arith.select %73, %64, %74 : vector<8x16xi1>, vector<8x16xf32>
    %cst_24 = arith.constant dense<0.000000e+00> : vector<8xf32>
    %76 = vector.multi_reduction <add>, %75, %cst_24 [1] : vector<8x16xf32> to vector<8xf32>
    %77 = vector.shape_cast %76 : vector<8xf32> to vector<8x1xf32>
    %78 = arith.extui %50 : vector<8x16xi1> to vector<8x16xi32>
    %79 = arith.sitofp %78 : vector<8x16xi32> to vector<8x16xf32>
    %cst_25 = arith.constant 0.000000e+00 : f32
    %80 = vector.shape_cast %71 : vector<1x16xi1> to vector<1x16xi1>
    %81 = vector.broadcast %80 : vector<1x16xi1> to vector<8x16xi1>
    %82 = vector.broadcast %cst_25 : f32 to vector<8x16xf32>
    %83 = arith.select %81, %79, %82 : vector<8x16xi1>, vector<8x16xf32>
    %cst_26 = arith.constant dense<0.000000e+00> : vector<8xf32>
    %84 = vector.multi_reduction <add>, %83, %cst_26 [1] : vector<8x16xf32> to vector<8xf32>
    %85 = vector.shape_cast %84 : vector<8xf32> to vector<8x1xf32>
    %86 = tpu.concatenate %77, %85 in 1 : vector<8x1xf32>, vector<8x1xf32> -> vector<8x2xf32>
    %c0_27 = arith.constant 0 : index
    %c0_28 = arith.constant 0 : index
    %c0_29 = arith.constant 0 : index
    %87 = vector.load %arg7[%c0_27, %c0_28, %c0_29] : memref<1x8x2xf32, #tpu.memory_space<vmem>>, vector<1x8x2xf32>
    %88 = vector.shape_cast %87 : vector<1x8x2xf32> to vector<8x2xf32>
    %89 = vector.shape_cast %86 : vector<8x2xf32> to vector<1x8x2xf32>
    tpu.vector_store %arg7[%c0_27, %c0_28, %c0_29], %89 {strides = array<i32>} : memref<1x8x2xf32, #tpu.memory_space<vmem>>, vector<1x8x2xf32>,
    return
  }
  func.func @transform_0(%arg0: i32) -> (i32, i32) {
    %c0_i32 = arith.constant 0 : i32
    %c0_i32_0 = arith.constant 0 : i32
    return %arg0, %c0_i32 : i32, i32
  }
  func.func @transform_1(%arg0: i32) -> (i32, i32) {
    %c0_i32 = arith.constant 0 : i32
    %c0_i32_0 = arith.constant 0 : i32
    %c0_i32_1 = arith.constant 0 : i32
    return %c0_i32, %c0_i32_0 : i32, i32
  }
  func.func @transform_2(%arg0: i32) -> (i32, i32) {
    %c0_i32 = arith.constant 0 : i32
    %c0_i32_0 = arith.constant 0 : i32
    %c0_i32_1 = arith.constant 0 : i32
    return %c0_i32, %c0_i32_0 : i32, i32
  }
  func.func @transform_3(%arg0: i32) -> (i32, i32) {
    %c0_i32 = arith.constant 0 : i32
    %c0_i32_0 = arith.constant 0 : i32
    return %c0_i32, %arg0 : i32, i32
  }
  func.func @transform_4(%arg0: i32) -> (i32, i32) {
    %c0_i32 = arith.constant 0 : i32
    %c0_i32_0 = arith.constant 0 : i32
    return %c0_i32, %arg0 : i32, i32
  }
  func.func @transform_5(%arg0: i32) -> (i32, i32) {
    %c0_i32 = arith.constant 0 : i32
    %c0_i32_0 = arith.constant 0 : i32
    return %c0_i32, %arg0 : i32, i32
  }
  func.func @transform_6(%arg0: i32) -> (i32, i32, i32) {
    %c0_i32 = arith.constant 0 : i32
    %c0_i32_0 = arith.constant 0 : i32
    %c0_i32_1 = arith.constant 0 : i32
    return %arg0, %c0_i32, %c0_i32_0 : i32, i32, i32
  }
}

</mosaic_0001>

<bundles_post_ra>
// kernel: tpu_custom_call.1
= control target key start
LH: loop header
LB: loop body
LE: loop exit
PB: predicated region body
PF: predicated region fallthrough
CT: control target
= control target key end

     0   :  { %12 = vsyncpa [#allocation3], 0  ;;  %s505_s0 = inlined_call_operand.vmem [shape: f32[16,32], index: 0, kind: input, shape index: {}]   ;;  %s506_s1 = inlined_call_operand.hbm [shape: f32[16,32], index: 1, kind: input, shape index: {}]   ;;  %s507_s2 = inlined_call_operand.vmem [shape: f32[16,1], index: 2, kind: input, shape index: {}]   ;;  %s508_s3 = inlined_call_operand.vmem [shape: f32[8,16], index: 3, kind: input, shape index: {}]   ;;  %s509_s4 = inlined_call_operand.hbm [shape: f32[8,16], index: 4, kind: output, shape index: {0}]   ;;  %s510_s5 = inlined_call_operand.hbm [shape: s32[2,16], index: 5, kind: output, shape index: {1}]   ;;  %s511_s6 = inlined_call_operand.vmem [shape: f32[1,8,2], index: 6, kind: output, shape index: {2}]  }
   0x1   :  { %13 = vsyncpa [#allocation4], 0 }
   0x2   :  { %14 = vsyncpa [#allocation7], 0  ;;  %s396_s21 = smov [#allocation2]   ;;  %s324_s25 = scalar_lea.hbm %s506_s1, 256 }
   0x3   :  { %s22_s22 = sshll.u32 %s396_s21, 4  ;;  %p325_p0 = scmp.ne.s32.totalorder %s506_s1, %s324_s25  ;;  %s23_s22 = int_to_ptr.vmem [resolvable:$true] %s22_s22 }
   0x4   :  { %p328_p1 = scmp.lt.u32.totalorder %s324_s25, %s506_s1 }
   0x6   :  { %p330_p2 = pnand %p328_p1, %p325_p0 }
   0x8   :  { %333 = shalt.err (!%p330_p2)
}
   0x9   :  { %s334_s30 = scalar_lea.vmem %s23_s22, 256  ;;  %p339_p4 = scmp.lt.s32.totalorder %s23_s22, %s23_s22 }
   0xa   :  { %p335_p3 = scmp.ne.s32.totalorder %s23_s22, %s334_s30  ;;  %p340_p5 = scmp.lt.s32.totalorder %s334_s30, %s334_s30 }
   0xc   :  { %p341_p6 = por %p340_p5, %p339_p4 }
   0xe   :  { %p342_p7 = pnand %p341_p6, %p335_p3 }
  0x10   :  { %345 = shalt.err (!%p342_p7)
}
  0x11   :  { %s397_s7 = smov 128   ;;  %s398_s8 = smov 8  }
  0x12   :  { %28 = dma.hbm_to_vmem [thread:$0]  %s506_s1, 256, %s23_s22, [#allocation3], %s397_s7, %s397_s7, %s398_s8  }
  0x13   :  { %390 = dma.done.wait [#allocation3], 256  }
  0x14   :  { %391 = vsyncadd [#allocation3], 4294967040  ;;  %v399_v0 = vmov 0   ;;  %vm52_vm0 = vcmask 261120   ;;  %v36_v1 = vld [vmem:[%s505_s0] sm:$0xff]  ;;  %v37_v2 = vld [vmem:[%s505_s0 + $0x8] sm:$0xff]  ;;  %v161_v36 = vlaneseq }
  0x15   :  { %315 = vset.pattern.permute.xlu0 %v399_v0  ;;  %vm303_vm1 = vmpackc.low %vm52_vm0, %vm52_vm0  ;;  %v38_v3 = vld [vmem:[#allocation2] sm:$0xff]  ;;  %v302_v4 = vpack.c.bf16 %v37_v2, %v36_v1  ;;  %v41_v5 = vld [vmem:[%s507_s2 + $0x8] sm:$0xff]  ;;  %vm163_vm4 = vcmask 130048   ;;  %vm206_vm13 = vcmask 1040384   ;;  %vm208_vm15 = vcmask 123904   ;;  %s402_s19 = smov [#allocation6]  }
  0x16   :  { %299 = vmatprep.mubr.msk.f32.mxu0 %vm52_vm0, %v38_v3  ;;  %49 = vperm.xlu0 %315, %v41_v5   ;;  %v40_v6 = vld [vmem:[%s507_s2] sm:$0xff]  ;;  %v39_v7 = vld [vmem:[#allocation2 + $0x8] sm:$0xff]  ;;  %v162_v39 = vshrl.u32 %v161_v36, 7  ;;  %v232_v0 = vand.u32 127, %v161_v36  ;;  %s269_s20 = sshll.u32 %s402_s19, 4  ;;  %s270_s20 = int_to_ptr.vmem [resolvable:$true] %s269_s20 }
  0x17   :  { %304 = vmatprep.subr.msk.bf16.mxu0 %vm303_vm1, %v302_v4  ;;  %v140_v26 = vld [vmem:[%s508_s3] sm:$0xff]  ;;  %s401_s3 = smov [#allocation5]  }
  0x18   :  { %307 = vmatpush3.bf16.xpose.msk.msra.mxu0 %vm303_vm1, %v302_v4  ;;  %vm236_vm1 = vcmp.lt.s32.totalorder %v232_v0, 16  ;;  %v400_v4 = vmov 0.0   ;;  %s259_s18 = sshll.u32 %s401_s3, 4  ;;  %s260_s18 = int_to_ptr.vmem [resolvable:$true] %s259_s18 }
  0x19   :  { %s346_s21 = scalar_lea.vmem %s260_s18, 128  ;;  %p351_p9 = scmp.lt.s32.totalorder %s260_s18, %s260_s18 }
  0x1a   :  { %44 = vperm.xlu0 %315, %v40_v6   ;;  %p347_p8 = scmp.ne.s32.totalorder %s260_s18, %s346_s21  ;;  %p352_p10 = scmp.lt.s32.totalorder %s346_s21, %s346_s21 }
  0x1c   :  { %p353_p11 = por %p352_p10, %p351_p9 }
  0x1e   :  { %p354_p12 = pnand %p353_p11, %p347_p8 }
  0x1f   :  { %300 = vmatmul.mubr.msk.f32.vlgmr.msra.gmra.mrb[0].mxu0 %vm52_vm0, %v39_v7 }
  0x95   :  { %v50_v8 = vpop.permute.xlu0 %49 }
  0x99   :  { %v45_v25 = vpop.permute.xlu0 %44 }
  0xf2   :  { %v301_v9 = vpop.f32.mrb[0].mxu0 }
  0xf3   :  { %v137_v10 = vadd.f32 %v301_v9, %v50_v8  ;;  %v131_v11 = vpop.f32.mrb[1].mxu0 }
  0xf4   :  { %v132_v29 = vadd.f32 %v131_v11, %v45_v25 }
  0xf5   :  { %v144_v12 = vand.u32 2147483647, %v137_v10  ;;  %v141_v23 = vmax.f32 %v137_v10, 0.0  ;;  %vm142_vm3 = vcmp.ne.f32.partialorder %v137_v10, %v137_v10 }
  0xf7   :  { %v145_v13 = vsub.f32 0.0, %v144_v12 }
  0xf9   :  { %v146_v14 = vmul.f32 1.442695, %v145_v13 }
  0xfb   :  { %316 = vpow2.f32 %v146_v14 }
 0x105   :  { %v317_v15 = vpop.eup %316 }
 0x106   :  { %v148_v16 = vadd.f32 1.0, %v317_v15  ;;  %v151_v17 = vmul.f32 -0.5, %v317_v15  ;;  %v154_v19 = vand.u32 2147483647, %v317_v15 }
 0x108   :  { %318 = vlog2.f32 %v148_v16  ;;  %v152_v18 = vadd.f32 1.0, %v151_v17  ;;  %vm155_vm2 = vcmp.lt.f32.partialorder %v154_v19, 0.0004427343 }
 0x10a   :  { %v153_v22 = vmul.f32 %v317_v15, %v152_v18 }
 0x112   :  { %v319_v20 = vpop.eup %318 }
 0x113   :  { %v150_v21 = vmul.f32 0.6931472, %v319_v20 }
 0x115   :  { %v156_v24 = vsel %vm155_vm2, %v153_v22, %v150_v21 }
 0x116   :  { %v157_v27 = vadd.f32 %v156_v24, %v141_v23 }
 0x118   :  { %v158_v28 = vsel %vm142_vm3, %v137_v10, %v157_v27 }
 0x119   :  { %v159_v30 = vmul.f32 %v158_v28, %v140_v26 }
 0x11b   :  { %v160_v31 = vadd.f32 %v159_v30, %v132_v29 }
 0x11d   :  { %v164_v32 = vsel %vm163_vm4, %v160_v31, -inf }
 0x11e   :  { %v165_v33 = vrot.slane %v164_v32, 4 }
 0x120   :  { %v166_v34 = vmax.f32 %v164_v32, %v165_v33 }
 0x122   :  { %v167_v35 = vrot.slane %v166_v34, 2 }
 0x124   :  { %v168_v37 = vmax.f32 %v166_v34, %v167_v35 }
 0x126   :  { %v169_v38 = vrot.slane %v168_v37, 1 }
 0x128   :  { %v170_v40 = vmax.f32 %v168_v37, %v169_v38 }
 0x12a   :  { %vm171_vm5 = vcmp.eq.f32.partialorder %v160_v31, %v170_v40 }
 0x12b   :  { %v172_v41 = vsel %vm171_vm5, %v162_v39, 8 }
 0x12c   :  { %v173_v42 = vsel %vm163_vm4, %v172_v41, 2147483647 }
 0x12d   :  { %v174_v43 = vrot.slane %v173_v42, 4 }
 0x12f   :  { %vm175_vm6 = vcmp.lt.s32.totalorder %v173_v42, %v174_v43 }
 0x130   :  { %v176_v44 = vsel %vm175_vm6, %v173_v42, %v174_v43 }
 0x131   :  { %v177_v45 = vrot.slane %v176_v44, 2 }
 0x133   :  { %vm178_vm7 = vcmp.lt.s32.totalorder %v176_v44, %v177_v45 }
 0x134   :  { %v179_v46 = vsel %vm178_vm7, %v176_v44, %v177_v45 }
 0x135   :  { %v180_v47 = vrot.slane %v179_v46, 1 }
 0x137   :  { %vm181_vm8 = vcmp.lt.s32.totalorder %v179_v46, %v180_v47 }
 0x138   :  { %v182_v48 = vsel %vm181_vm8, %v179_v46, %v180_v47 }
 0x139   :  { %vm183_vm9 = vcmp.eq.s32.totalorder %v162_v39, %v182_v48 }
 0x13a   :  { %v184_v49 = vsel %vm183_vm9, -inf, %v160_v31 }
 0x13b   :  { %v185_v50 = vsel %vm163_vm4, %v184_v49, -inf }
 0x13c   :  { %v186_v51 = vrot.slane %v185_v50, 4 }
 0x13e   :  { %v187_v52 = vmax.f32 %v185_v50, %v186_v51 }
 0x140   :  { %v188_v53 = vrot.slane %v187_v52, 2 }
 0x142   :  { %v189_v54 = vmax.f32 %v187_v52, %v188_v53 }
 0x144   :  { %v190_v55 = vrot.slane %v189_v54, 1 }
 0x146   :  { %v191_v56 = vmax.f32 %v189_v54, %v190_v55 }
 0x148   :  { %vm192_vm10 = vcmp.eq.f32.partialorder %v184_v49, %v191_v56 }
 0x149   :  { %v193_v57 = vsel %vm192_vm10, %v162_v39, 8 }
 0x14a   :  { %v194_v58 = vsel %vm163_vm4, %v193_v57, 2147483647 }
 0x14b   :  { %v195_v59 = vrot.slane %v194_v58, 4 }
 0x14d   :  { %vm196_vm11 = vcmp.lt.s32.totalorder %v194_v58, %v195_v59 }
 0x14e   :  { %v197_v60 = vsel %vm196_vm11, %v194_v58, %v195_v59 }
 0x14f   :  { %v198_v61 = vrot.slane %v197_v60, 2 }
 0x151   :  { %vm199_vm12 = vcmp.lt.s32.totalorder %v197_v60, %v198_v61 }
 0x152   :  { %v200_v62 = vsel %vm199_vm12, %v197_v60, %v198_v61 }
 0x153   :  { %v201_v63 = vrot.slane %v200_v62, 1 }
 0x155   :  { %vm202_vm14 = vcmp.lt.s32.totalorder %v200_v62, %v201_v63 }
 0x156   :  { %v203_v1 = vsel %vm202_vm14, %v200_v62, %v201_v63 }
 0x157   :  { %vm204_vm0 = vcmp.eq.s32.totalorder %v162_v39, %v203_v1  ;;  %v207_v2 = vsel %vm206_vm13, %v182_v48, %v203_v1 }
 0x158   :  { %vm205_vm2 = vmor %vm183_vm9, %vm204_vm0  ;;  %209 = vst.msk [vmem:[#allocation6] sm:$0x3] %vm208_vm15, %v207_v2 }
 0x159   :  { %v210_v3 = vsel %vm205_vm2, %v160_v31, -inf  ;;  %v290_v5 = vsel %vm205_vm2, 1.0, %v400_v4 }
 0x15a   :  { %v211_v6 = vsel %vm163_vm4, %v210_v3, -inf  ;;  %v245_v7 = vsel %vm236_vm1, %v290_v5, 0.0 }
 0x15b   :  { %v212_v8 = vrot.slane %v211_v6, 4  ;;  %v246_v28 = vsel %vm163_vm4, %v245_v7, 0.0 }
 0x15d   :  { %v213_v9 = vmax.f32 %v211_v6, %v212_v8 }
 0x15f   :  { %v214_v10 = vrot.slane %v213_v9, 2 }
 0x161   :  { %v215_v11 = vmax.f32 %v213_v9, %v214_v10 }
 0x163   :  { %v216_v12 = vrot.slane %v215_v11, 1 }
 0x165   :  { %v217_v13 = vmax.f32 %v215_v11, %v216_v12 }
 0x167   :  { %v218_v14 = vsub.f32 %v210_v3, %v217_v13 }
 0x169   :  { %v219_v15 = vmul.f32 1.442695, %v218_v14 }
 0x16b   :  { %320 = vpow2.f32 %v219_v15 }
 0x175   :  { %v321_v16 = vpop.eup %320 }
 0x176   :  { %v221_v17 = vsel %vm163_vm4, %v321_v16, 0.0 }
 0x177   :  { %v222_v18 = vrot.slane %v221_v17, 4 }
 0x179   :  { %v223_v19 = vadd.f32 %v222_v18, %v221_v17 }
 0x17b   :  { %v224_v20 = vrot.slane %v223_v19, 2 }
 0x17d   :  { %v225_v21 = vadd.f32 %v224_v20, %v223_v19 }
 0x17f   :  { %v226_v22 = vrot.slane %v225_v21, 1 }
 0x181   :  { %v227_v23 = vadd.f32 %v226_v22, %v225_v21 }
 0x183   :  { %322 = vrcp.f32 %v227_v23 }
 0x18d   :  { %v323_v24 = vpop.eup %322 }
 0x18e   :  { %v229_v25 = vmul.f32 %v323_v24, %v321_v16 }
 0x190   :  { %v239_v26 = vsel %vm236_vm1, %v229_v25, 0.0  ;;  %230 = vst.msk [vmem:[#allocation5] sm:$0xff] %vm163_vm4, %v229_v25 }
 0x191   :  { %v240_v27 = vsel %vm163_vm4, %v239_v26, 0.0 }
 0x192   :  { %241 = vadd.xlane.f32.xlu1 %v240_v27 }
 0x196   :  { %247 = vadd.xlane.f32.xlu1 %v246_v28 }
 0x197   :  { %357 = shalt.err (!%p354_p12)
}
 0x198   :  { %s358_s24 = scalar_lea.hbm %s509_s4, 128 }
 0x199   :  { %p359_p13 = scmp.ne.s32.totalorder %s509_s4, %s358_s24  ;;  %p362_p0 = scmp.lt.u32.totalorder %s358_s24, %s509_s4 }
 0x19b   :  { %p364_p1 = pnand %p362_p0, %p359_p13 }
 0x19d   :  { %367 = shalt.err (!%p364_p1)
}
 0x19e   :  { %262 = dma.vmem_to_hbm [thread:$0]  %s260_s18, 128, %s509_s4, [#allocation4]  }
 0x19f   :  { %s368_s7 = scalar_lea.vmem %s270_s20, 32  ;;  %p373_p3 = scmp.lt.s32.totalorder %s270_s20, %s270_s20 }
 0x1a0   :  { %p369_p2 = scmp.ne.s32.totalorder %s270_s20, %s368_s7  ;;  %p374_p4 = scmp.lt.s32.totalorder %s368_s7, %s368_s7 }
 0x1a2   :  { %p375_p5 = por %p374_p4, %p373_p3 }
 0x1a4   :  { %p376_p6 = pnand %p375_p5, %p369_p2 }
 0x1a6   :  { %379 = shalt.err (!%p376_p6)
}
 0x1a7   :  { %s380_s10 = scalar_lea.hbm %s510_s5, 32 }
 0x1a8   :  { %p381_p7 = scmp.ne.s32.totalorder %s510_s5, %s380_s10  ;;  %p384_p8 = scmp.lt.u32.totalorder %s380_s10, %s510_s5 }
 0x1aa   :  { %p386_p9 = pnand %p384_p8, %p381_p7 }
 0x1ac   :  { %389 = shalt.err (!%p386_p9)
}
 0x1ad   :  { %272 = dma.vmem_to_hbm [thread:$0]  %s270_s20, 32, %s510_s5, [#allocation7]   ;;  %vm249_vm3 = vcmask 7168   ;;  %vm251_vm4 = vcmask 15360  }
 0x21f   :  { %v242_v29 = vpop.xlane.xlu1 %241 }
 0x223   :  { %v248_v30 = vpop.xlane.xlu1 %247 }
 0x224   :  { %v250_v31 = vsel %vm249_vm3, %v242_v29, %v248_v30 }
 0x225   :  { %252 = vst.msk [vmem:[%s511_s6] sm:$0xff] %vm251_vm4, %v250_v31 }
 0x226   :  { %392 = dma.done.wait [#allocation4], 128  }
 0x227   :  { %393 = vsyncadd [#allocation4], 4294967168 }
 0x228   :  { %394 = dma.done.wait [#allocation7], 32  }
 0x229   :  { %395 = vsyncadd [#allocation7], 4294967264 }
 0x22a   :  { %283 = vsyncpa [#allocation3], 1 }
 0x22b   :  { %284 = vsyncpa [#allocation4], 1 }
 0x22c   :  { %285 = vsyncpa [#allocation7], 1 }

</bundles_post_ra>
